<compile_context>
chip_gen: v5e
topology: v5e:2x2
jax: 0.10.0
libtpu: 0.0.40
codegen_flags: <defaults>
</compile_context>

<pallas_src>
import functools

import jax
import jax.numpy as jnp
from jax.experimental import pallas as pl
from jax.experimental.pallas import tpu as pltpu


def _avg_pool_kernel(x_ref, o_ref, acc_ref, *, inv_s):
    # Grid = (B tiles, H tiles, S tiles); S (reduction) is the innermost axis.
    k = pl.program_id(2)

    @pl.when(k == 0)
    def _init():
        acc_ref[...] = jnp.zeros_like(acc_ref)

    # Partial sum in f32 (VPU adds only; kernel is HBM-bandwidth bound).
    acc_ref[...] += jnp.sum(x_ref[...].astype(jnp.float32), axis=1)

    @pl.when(k == pl.num_programs(2) - 1)
    def _finalize():
        # Single scale by the compile-time constant 1/S at the very end.
        o_ref[...] = (acc_ref[...] * inv_s).astype(o_ref.dtype)


def _pick_divisor(dim, candidates):
    """Largest candidate that evenly divides `dim`; fall back to full dim."""
    for c in candidates:
        if c <= dim and dim % c == 0:
            return c
    return dim


def _pick_batch_block(b):
    # Output block sublane dim must be a multiple of 8 or equal the full dim.
    if b % 8 == 0:
        for c in (32, 16, 8):
            if b % c == 0:
                return c
    return b


def avg_pooler(x):
    """Pallas equivalent of AvgPooler().forward(x): mean over dim=-2."""
    assert x.ndim >= 2, "AvgPooler needs >= 2 dims for mean over dim=-2"
    *lead, S, H = x.shape
    B = 1
    for d in lead:
        B *= d
    x3 = x.reshape(B, S, H)  # collapse leading dims (free, contiguous)

    in_bytes = x.dtype.itemsize

    # --- tile selection -----------------------------------------------------
    Bt = _pick_batch_block(B)
    # Lane axis: multiples of 128 when possible, else full H (legal block).
    # NOTE: for H < 128 the output stores are lane-masked; padding the input
    # to 128 lanes would double HBM read traffic, so we keep H as-is.
    Ht = _pick_divisor(H, (1024, 512, 256, 128))
    # Reduction axis: multiples of 8 when possible, else full S (legal block).
    St = _pick_divisor(S, (1024, 512, 256, 128, 64, 32, 16, 8))

    # Keep one input buffer <= ~8 MiB so the double-buffered pipeline fits
    # comfortably inside v7x's smaller VMEM (and v5e's 16 MiB scoped default).
    budget = 8 * 1024 * 1024
    while Bt * St * Ht * in_bytes > budget:
        if St % 16 == 0:
            St //= 2          # stays a multiple of 8 and a divisor of S
        elif Ht % 256 == 0:
            Ht //= 2          # stays a multiple of 128 and a divisor of H
        else:
            break

    grid = (B // Bt, H // Ht, S // St)

    # Explicit scoped-VMEM limit: 2x double-buffered input + output + f32 acc.
    footprint = (2 * Bt * St * Ht * in_bytes
                 + 2 * Bt * Ht * in_bytes
                 + Bt * Ht * 4)
    vmem_limit = int(min(max(2 * footprint, 32 * 1024 * 1024),
                         48 * 1024 * 1024))

    kernel = functools.partial(_avg_pool_kernel, inv_s=float(1.0 / S))

    out = pl.pallas_call(
        kernel,
        out_shape=jax.ShapeDtypeStruct((B, H), x.dtype),
        grid_spec=pltpu.PrefetchScalarGridSpec(
            num_scalar_prefetch=0,
            grid=grid,
            in_specs=[pl.BlockSpec((Bt, St, Ht), lambda b, h, k: (b, k, h))],
            out_specs=pl.BlockSpec((Bt, Ht), lambda b, h, k: (b, h)),
            scratch_shapes=[pltpu.VMEM((Bt, Ht), jnp.float32)],
        ),
        compiler_params=pltpu.CompilerParams(
            # batch / hidden shard across TCs (v7x megacore); S is the reduction.
            dimension_semantics=("parallel", "parallel", "arbitrary"),
            vmem_limit_bytes=vmem_limit,
        ),
    )(x3)

    return out.reshape(*lead, H)


if __name__ == "__main__":
    key = jax.random.PRNGKey(0)

    # 1) Small shape matching the module's typical use: (batch, seq, hidden).
    B, S, H = 2, 8, 32
    x = jax.random.normal(key, (B, S, H), dtype=jnp.float32)
    out = jax.block_until_ready(avg_pooler(x))
    ref = jnp.mean(x, axis=-2)
    assert out.shape == ref.shape == (B, H)
    assert jnp.allclose(out, ref, atol=1e-5, rtol=1e-5)

    # 2) Larger shape exercising the S-reduction grid axis + accumulator path.
    k2 = jax.random.fold_in(key, 1)
    x2 = jax.random.normal(k2, (4, 2048, 256), dtype=jnp.float32)
    out2 = jax.block_until_ready(avg_pooler(x2))
    ref2 = jnp.mean(x2, axis=-2)
    assert out2.shape == ref2.shape
    assert jnp.allclose(out2, ref2, atol=1e-5, rtol=1e-5)

    # 3) Rank-4 input (mean over dim=-2 keeps all other dims).
    k3 = jax.random.fold_in(key, 2)
    x3 = jax.random.normal(k3, (2, 3, 8, 32), dtype=jnp.float32)
    out3 = jax.block_until_ready(avg_pooler(x3))
    ref3 = jnp.mean(x3, axis=-2)
    assert out3.shape == ref3.shape == (2, 3, 32)
    assert jnp.allclose(out3, ref3, atol=1e-5, rtol=1e-5)

    print("KERNEL_OK")
</pallas_src>

<mosaic_0001>
module attributes {stable_mosaic.version = 11 : i64} {
  func.func @_avg_pool_kernel(%arg0: i32, %arg1: i32, %arg2: i32, %arg3: memref<2x8x32xf32, #tpu.memory_space<vmem>>, %arg4: memref<2x32xf32, #tpu.memory_space<vmem>>, %arg5: memref<2x32xf32, #tpu.memory_space<vmem>>) attributes {dimension_semantics = [#tpu.dimension_semantics<parallel>, #tpu.dimension_semantics<parallel>, #tpu.dimension_semantics<arbitrary>], iteration_bounds = array<i64: 1, 1, 1>, scalar_prefetch = 0 : i64, scratch_operands = 1 : i64, tpu.core_type = #tpu.core_type<tc>, window_params = [{transform_indices = @transform_0, window_bounds = array<i64: 2, 8, 32>}, {transform_indices = @transform_1, window_bounds = array<i64: 2, 32>}]} {
    %c0_i32 = arith.constant 0 : i32
    %0 = arith.cmpi eq, %arg2, %c0_i32 : i32
    %1 = arith.extui %0 : i1 to i32
    %c0_i32_0 = arith.constant 0 : i32
    %2 = arith.cmpi ne, %1, %c0_i32_0 : i32
    scf.if %2 {
      %cst_9 = arith.constant 0.000000e+00 : f32
      %11 = vector.broadcast %cst_9 : f32 to vector<2x32xf32>
      %c0_10 = arith.constant 0 : index
      %c0_11 = arith.constant 0 : index
      %12 = vector.load %arg5[%c0_10, %c0_11] : memref<2x32xf32, #tpu.memory_space<vmem>>, vector<2x32xf32>
      tpu.vector_store %arg5[%c0_10, %c0_11], %11 {strides = array<i32>} : memref<2x32xf32, #tpu.memory_space<vmem>>, vector<2x32xf32>,
    } else {
    }
    %c0 = arith.constant 0 : index
    %c0_1 = arith.constant 0 : index
    %3 = vector.load %arg5[%c0, %c0_1] : memref<2x32xf32, #tpu.memory_space<vmem>>, vector<2x32xf32>
    %c0_2 = arith.constant 0 : index
    %c0_3 = arith.constant 0 : index
    %c0_4 = arith.constant 0 : index
    %4 = vector.load %arg3[%c0_2, %c0_3, %c0_4] : memref<2x8x32xf32, #tpu.memory_space<vmem>>, vector<2x8x32xf32>
    %cst = arith.constant dense<0.000000e+00> : vector<2x32xf32>
    %5 = vector.multi_reduction <add>, %4, %cst [1] : vector<2x8x32xf32> to vector<2x32xf32>
    %6 = arith.addf %3, %5 : vector<2x32xf32>
    %c0_5 = arith.constant 0 : index
    %c0_6 = arith.constant 0 : index
    %7 = vector.load %arg5[%c0_5, %c0_6] : memref<2x32xf32, #tpu.memory_space<vmem>>, vector<2x32xf32>
    tpu.vector_store %arg5[%c0_5, %c0_6], %6 {strides = array<i32>} : memref<2x32xf32, #tpu.memory_space<vmem>>, vector<2x32xf32>,
    %c0_i32_7 = arith.constant 0 : i32
    %8 = arith.cmpi eq, %arg2, %c0_i32_7 : i32
    %9 = arith.extui %8 : i1 to i32
    %c0_i32_8 = arith.constant 0 : i32
    %10 = arith.cmpi ne, %9, %c0_i32_8 : i32
    scf.if %10 {
      %c0_9 = arith.constant 0 : index
      %c0_10 = arith.constant 0 : index
      %11 = vector.load %arg5[%c0_9, %c0_10] : memref<2x32xf32, #tpu.memory_space<vmem>>, vector<2x32xf32>
      %cst_11 = arith.constant 1.250000e-01 : f32
      %12 = vector.broadcast %cst_11 : f32 to vector<2x32xf32>
      %13 = arith.mulf %11, %12 : vector<2x32xf32>
      %c0_12 = arith.constant 0 : index
      %c0_13 = arith.constant 0 : index
      %14 = vector.load %arg4[%c0_12, %c0_13] : memref<2x32xf32, #tpu.memory_space<vmem>>, vector<2x32xf32>
      tpu.vector_store %arg4[%c0_12, %c0_13], %13 {strides = array<i32>} : memref<2x32xf32, #tpu.memory_space<vmem>>, vector<2x32xf32>,
    } else {
    }
    return
  }
  func.func @transform_0(%arg0: i32, %arg1: i32, %arg2: i32) -> (i32, i32, i32) {
    %c0_i32 = arith.constant 0 : i32
    return %arg0, %arg2, %arg1 : i32, i32, i32
  }
  func.func @transform_1(%arg0: i32, %arg1: i32, %arg2: i32) -> (i32, i32) {
    %c0_i32 = arith.constant 0 : i32
    return %arg0, %arg1 : i32, i32
  }
}

</mosaic_0001>

<bundles_post_ra>
// kernel: tpu_custom_call.1
= control target key start
LH: loop header
LB: loop body
LE: loop exit
PB: predicated region body
PF: predicated region fallthrough
CT: control target
= control target key end

     0   :  { %6 = vsyncpa [#allocation4], 0  ;;  %s161_s0 = inlined_call_operand.hbm [shape: f32[2,8,32], index: 0, kind: input, shape index: {}]   ;;  %s162_s1 = inlined_call_operand.hbm [shape: f32[2,32], index: 1, kind: output, shape index: {}]  }
   0x1   :  { %7 = vsyncpa [#allocation5], 0  ;;  %s12_s8 = sshll.u32 %s161_s0, 4  ;;  %s137_s9 = smov [#allocation3]   ;;  %s13_s8 = int_to_ptr.hbm [resolvable:$true] %s12_s8 }
   0x2   :  { %s14_s10 = sshll.u32 %s137_s9, 4  ;;  %s138_s11 = smov 128   ;;  %s15_s10 = int_to_ptr.vmem [resolvable:$true] %s14_s10 }
   0x3   :  { %s139_s12 = smov 8  }
   0x4   :  { %20 = dma.hbm_to_vmem [thread:$0]  %s13_s8, 256, %s15_s10, [#allocation4], %s138_s11, %s138_s11, %s139_s12  }
   0x5   :  { %133 = dma.done.wait [#allocation4], 256  }
   0x6   :  { %134 = vsyncadd [#allocation4], 4294967040  ;;  %vm29_vm0 = vcmask 254976   ;;  %v140_v0 = vmov 0.0   ;;  %vm34_vm1 = vcmask 261120   ;;  %v32_v1 = vld [vmem:[#allocation3] sm:$0xff] }
   0x7   :  { %30 = vst.msk [vmem:[#allocation2] sm:$0x3] %vm29_vm0, %v140_v0  ;;  %v33_v2 = vld [vmem:[#allocation3 + $0x8] sm:$0xff]  ;;  %v35_v3 = vsel %vm34_vm1, %v32_v1, 0.0  ;;  %vm51_vm2 = vcmask 1041409   ;;  %s141_s0 = smov [#allocation6]  }
   0x8   :  { %v42_v4 = vsel %vm34_vm1, %v33_v2, 0.0  ;;  %v36_v5 = vrot.slane %v35_v3, 4  ;;  %s68_s13 = sshll.u32 %s141_s0, 4  ;;  %s70_s16 = sshll.u32 %s162_s1, 4  ;;  %s69_s13 = int_to_ptr.vmem [resolvable:$true] %s68_s13  ;;  %s71_s16 = int_to_ptr.hbm [resolvable:$true] %s70_s16 }
   0x9   :  { %v43_v6 = vrot.slane %v42_v4, 4 }
   0xa   :  { %v37_v7 = vadd.f32 %v36_v5, %v35_v3 }
   0xb   :  { %v44_v8 = vadd.f32 %v43_v6, %v42_v4 }
   0xc   :  { %v38_v9 = vrot.slane %v37_v7, 2 }
   0xd   :  { %v45_v10 = vrot.slane %v44_v8, 2 }
   0xe   :  { %v39_v11 = vadd.f32 %v38_v9, %v37_v7  ;;  %v31_v15 = vld [vmem:[#allocation2] sm:$0x3] }
   0xf   :  { %v46_v12 = vadd.f32 %v45_v10, %v44_v8 }
  0x10   :  { %v40_v13 = vrot.slane %v39_v11, 1 }
  0x11   :  { %v47_v14 = vrot.slane %v46_v12, 1 }
  0x12   :  { %v41_v16 = vadd.f32 %v40_v13, %v39_v11 }
  0x13   :  { %v48_v17 = vadd.f32 %v47_v14, %v46_v12 }
  0x15   :  { %v52_v18 = vsel %vm51_vm2, %v48_v17, %v41_v16 }
  0x16   :  { %v54_v19 = vadd.f32 %v52_v18, %v31_v15 }
  0x18   :  { %56 = vst.msk [vmem:[#allocation2] sm:$0x3] %vm29_vm0, %v54_v19 }
  0x1f   :  { %v60_v20 = vld [vmem:[#allocation2] sm:$0x3] }
  0x20   :  { %v61_v21 = vmul.f32 0.125, %v60_v20 }
  0x22   :  { %62 = vst.msk [vmem:[#allocation6] sm:$0x3] %vm29_vm0, %v61_v21 }
  0x23   :  { %73 = dma.vmem_to_hbm [thread:$0]  %s69_s13, 32, %s71_s16, [#allocation5]  }
  0x24   :  { %135 = dma.done.wait [#allocation5], 32  }
  0x25   :  { %136 = vsyncadd [#allocation5], 4294967264 }
  0x26   :  { %78 = vsyncpa [#allocation4], 1 }
  0x27   :  { %79 = vsyncpa [#allocation5], 1 }

</bundles_post_ra>
